<compile_context>
chip_gen: v7x
topology: tpu7x:2x2x1
jax: 0.10.0
libtpu: 0.0.40
codegen_flags: <defaults>
</compile_context>

<pallas_src>
import functools

import jax
import jax.numpy as jnp
from jax.experimental import pallas as pl
from jax.experimental.pallas import tpu as pltpu


def tdm_kernel(ids_ref, emb_ref, wcat_ref, cbias_ref, fcw_ref, fcb_ref, out_ref,
               *, seq_len):
    # ids_ref  : (bb*S, 1)   int32  token ids for one batch tile (flattened)
    # emb_ref  : (V_pad, E)  bf16   embedding table (rows >= V are zero)
    # wcat_ref : (3E, H)     bf16   conv taps stacked [W0^T; W1^T; W2^T]
    # cbias_ref: (1, H)      f32    conv bias
    # fcw_ref  : (H, C_pad)  bf16   fc weight^T, zero-padded to 128 lanes
    # fcb_ref  : (1, C_pad)  f32    fc bias, zero-padded
    # out_ref  : (bb, C_pad) f32    logits (true C columns; rest are zero lanes)
    S = seq_len
    M = ids_ref.shape[0]                       # bb * S rows
    bb = M // S
    V_pad, E = emb_ref.shape
    H = wcat_ref.shape[1]

    # --- Embedding gather in-kernel: one-hot bf16 MXU matmul. Exact, since each
    # output row selects exactly one bf16 table row (no summation rounding).
    ids = ids_ref[...]                                              # (M, 1) int32
    vocab_iota = jax.lax.broadcasted_iota(jnp.int32, (M, V_pad), 1)
    onehot = (vocab_iota == ids).astype(jnp.bfloat16)               # (M, V_pad)
    x2d = jnp.dot(onehot, emb_ref[...],
                  preferred_element_type=jnp.float32)               # (M, E) f32

    # --- Conv1d(k=3, pad=1) as ONE K=3E matmul. Off-center taps are realigned
    # with pltpu.roll (XLU) on the flat, narrow (M, E) activation and masked at
    # sequence boundaries; the masks also zero the rows where the flat roll
    # would leak across batch boundaries, so zero padding is reproduced exactly.
    pos = jax.lax.broadcasted_iota(jnp.int32, (M, 1), 0) % S        # position within sequence
    x_l = jnp.where(pos >= 1, pltpu.roll(x2d, 1, axis=0), 0.0)          # x[s-1]
    x_r = jnp.where(pos <= S - 2, pltpu.roll(x2d, M - 1, axis=0), 0.0)  # x[s+1]
    # Values are exactly bf16-representable (table entries / zeros) -> exact cast.
    x_cat = jnp.concatenate([x_l, x2d, x_r], axis=1).astype(jnp.bfloat16)  # (M, 3E)

    acc = jnp.dot(x_cat, wcat_ref[...],
                  preferred_element_type=jnp.float32)               # (M, H) f32
    conv = jnp.maximum(acc + cbias_ref[...], 0.0)                   # bias + ReLU

    # Single reshape of a large tensor, right before the pooling reduction.
    pooled = jnp.max(conv.reshape(bb, S, H), axis=1)                # (bb, H)

    # --- Linear(H -> C) on the lane-dense, zero-padded C block (bf16 MXU).
    logits = jnp.dot(pooled.astype(jnp.bfloat16), fcw_ref[...],
                     preferred_element_type=jnp.float32) + fcb_ref[...]
    # TODO(synk): nn.Dropout is identity at inference; no stochastic mask applied.
    out_ref[...] = logits.astype(out_ref.dtype)


def tdm_forward(text, emb_table, conv_w, conv_b, fc_w, fc_b,
                *, block_b=None, target_rows=1024):
    """Wrapper: weight re-layout + batch-gridded pallas_call (gather is in-kernel)."""
    B, S = text.shape
    V, E = emb_table.shape
    H = conv_w.shape[0]
    C = fc_w.shape[0]

    # --- Batch tile: aim for M = bb*S ~ target_rows matmul rows per grid step
    # (fills the MXU M dim and amortizes the ~0.35us/step overhead), rounded to
    # the 8-sublane granule and not larger than the (padded) batch itself.
    if block_b is None:
        bb = (max(8, target_rows // max(S, 1)) // 8) * 8
        bb = max(8, min(512, bb))
    else:
        bb = max(8, (int(block_b) // 8) * 8)
    bb = min(bb, ((B + 7) // 8) * 8)
    num_blocks = pl.cdiv(B, bb)
    B_pad = num_blocks * bb
    # TODO(synk): for very long sequences, add a second "arbitrary" grid axis
    # over S with a running-max VMEM accumulator (halo of 1 row for the taps)
    # so the (bb, S_tile, H) intermediates fit v7x's 64 MiB without shrinking bb.

    ids = text.astype(jnp.int32)
    if B_pad != B:
        ids = jnp.pad(ids, ((0, B_pad - B), (0, 0)))   # pad rows -> token 0 (zero row)
    ids_flat = ids.reshape(B_pad * S, 1)               # flat id column per matmul row

    # --- Embedding table: vocab lane-padded to 128, bf16 MXU operand, zero tail.
    V_pad = ((V + 127) // 128) * 128
    emb_pad = jnp.zeros((V_pad, E), jnp.bfloat16).at[:V, :].set(
        emb_table.astype(jnp.bfloat16))
    # TODO(synk): for large vocabularies keep the table in HBM (pl.ANY) and
    # DMA-gather rows with scalar-prefetched ids instead of the one-hot matmul.

    # --- Conv taps stacked along K: rows [W0^T; W1^T; W2^T] -> (3E, H).
    wcat = jnp.concatenate([conv_w[:, :, k].T for k in range(3)],
                           axis=0).astype(jnp.bfloat16)
    cbias = conv_b.reshape(1, H).astype(jnp.float32)

    # --- FC weight transposed + zero-padded to a lane-dense 128-wide block.
    C_pad = max(128, ((C + 127) // 128) * 128)
    fcw = jnp.zeros((H, C_pad), jnp.bfloat16).at[:, :C].set(
        fc_w.T.astype(jnp.bfloat16))
    fcb = jnp.zeros((1, C_pad), jnp.float32).at[:, :C].set(fc_b.astype(jnp.float32))

    kernel = functools.partial(tdm_kernel, seq_len=S)
    out = pl.pallas_call(
        kernel,
        out_shape=jax.ShapeDtypeStruct((B_pad, C_pad), jnp.float32),
        grid_spec=pltpu.PrefetchScalarGridSpec(
            num_scalar_prefetch=0,
            grid=(num_blocks,),
            in_specs=[
                pl.BlockSpec((bb * S, 1), lambda i: (i, 0)),    # token ids tile
                # Grid-invariant operands (constant index maps): Pallas DMAs
                # them once; total footprint is only ~100 KiB of VMEM.
                pl.BlockSpec((V_pad, E), lambda i: (0, 0)),     # emb table (resident)
                pl.BlockSpec((3 * E, H), lambda i: (0, 0)),     # conv taps
                pl.BlockSpec((1, H), lambda i: (0, 0)),         # conv bias
                pl.BlockSpec((H, C_pad), lambda i: (0, 0)),     # fc weight
                pl.BlockSpec((1, C_pad), lambda i: (0, 0)),     # fc bias
            ],
            out_specs=pl.BlockSpec((bb, C_pad), lambda i: (i, 0)),
        ),
        compiler_params=pltpu.CompilerParams(
            dimension_semantics=("parallel",),       # shard batch tiles across TCs
            vmem_limit_bytes=48 * 1024 * 1024,       # < v7x 64 MiB, > 32 MiB default
        ),
    )(ids_flat, emb_pad, wcat, cbias, fcw, fcb)
    return out[:B, :C]


if __name__ == "__main__":
    # Small, deterministic problem sizes consistent with the module
    # (hidden_dim default 128, num_classes default 1).
    VOCAB, E, H, C = 50, 32, 128, 1
    B, S = 2, 8

    key = jax.random.PRNGKey(0)
    k_emb, k_cw, k_cb, k_fw, k_fb, k_txt = jax.random.split(key, 6)

    # Embedding: N(0,1) with row 0 zeroed (padding_idx=0).
    emb_table = jax.random.normal(k_emb, (VOCAB, E), dtype=jnp.float32)
    emb_table = emb_table.at[0].set(0.0)

    # Conv1d(E -> H, k=3): PyTorch-style uniform init.
    conv_bound = 1.0 / (E * 3) ** 0.5
    conv_w = jax.random.uniform(k_cw, (H, E, 3), jnp.float32,
                                -conv_bound, conv_bound)
    conv_b = jax.random.uniform(k_cb, (H,), jnp.float32,
                                -conv_bound, conv_bound)

    # Linear(H -> C).
    fc_bound = 1.0 / H ** 0.5
    fc_w = jax.random.uniform(k_fw, (C, H), jnp.float32, -fc_bound, fc_bound)
    fc_b = jax.random.uniform(k_fb, (C,), jnp.float32, -fc_bound, fc_bound)

    # Input token ids (include some padding-idx zeros).
    text = jax.random.randint(k_txt, (B, S), 0, VOCAB, dtype=jnp.int32)

    out = tdm_forward(text, emb_table, conv_w, conv_b, fc_w, fc_b)
    out = jax.block_until_ready(out)

    # Pure-JAX reference of the same forward pass (same bf16 rounding of the
    # MXU operands as the kernel: emb table, conv taps, pooled, fc weight).
    emb_q = emb_table.astype(jnp.bfloat16).astype(jnp.float32)
    cw_q = conv_w.astype(jnp.bfloat16).astype(jnp.float32)
    embedded = jnp.take(emb_q, text, axis=0)                 # (B, S, E)
    xpad = jnp.pad(embedded, ((0, 0), (1, 1), (0, 0)))       # (B, S+2, E)
    conv_ref = jnp.zeros((B, S, H), jnp.float32)
    for k in range(3):
        conv_ref = conv_ref + jnp.einsum(
            'bse,he->bsh', xpad[:, k:k + S, :], cw_q[:, :, k],
            preferred_element_type=jnp.float32)
    conv_ref = jnp.maximum(conv_ref + conv_b[None, None, :], 0.0)
    pooled_ref = jnp.max(conv_ref, axis=1)                   # (B, H)
    ref = jnp.dot(pooled_ref.astype(jnp.bfloat16),
                  fc_w.astype(jnp.bfloat16).T,
                  preferred_element_type=jnp.float32) + fc_b[None, :]

    assert out.shape == (B, C), out.shape
    assert jnp.allclose(out, ref, atol=5e-3, rtol=5e-3), (out, ref)

    print("KERNEL_OK")
</pallas_src>

<mosaic_0001>
module attributes {stable_mosaic.version = 11 : i64} {
  func.func @tdm_kernel(%arg0: i32, %arg1: memref<64x1xi32, #tpu.memory_space<vmem>>, %arg2: memref<128x32xbf16, #tpu.memory_space<vmem>>, %arg3: memref<96x128xbf16, #tpu.memory_space<vmem>>, %arg4: memref<1x128xf32, #tpu.memory_space<vmem>>, %arg5: memref<128x128xbf16, #tpu.memory_space<vmem>>, %arg6: memref<1x128xf32, #tpu.memory_space<vmem>>, %arg7: memref<8x128xf32, #tpu.memory_space<vmem>>) attributes {dimension_semantics = [#tpu.dimension_semantics<parallel>], iteration_bounds = array<i64: 1>, scalar_prefetch = 0 : i64, scratch_operands = 0 : i64, tpu.core_type = #tpu.core_type<tc>, window_params = [{transform_indices = @transform_0, window_bounds = array<i64: 64, 1>}, {pipeline_mode = #tpu.pipeline_mode<synchronous>, transform_indices = @transform_1, window_bounds = array<i64: 128, 32>}, {pipeline_mode = #tpu.pipeline_mode<synchronous>, transform_indices = @transform_2, window_bounds = array<i64: 96, 128>}, {pipeline_mode = #tpu.pipeline_mode<synchronous>, transform_indices = @transform_3, window_bounds = array<i64: 1, 128>}, {pipeline_mode = #tpu.pipeline_mode<synchronous>, transform_indices = @transform_4, window_bounds = array<i64: 128, 128>}, {pipeline_mode = #tpu.pipeline_mode<synchronous>, transform_indices = @transform_5, window_bounds = array<i64: 1, 128>}, {transform_indices = @transform_6, window_bounds = array<i64: 8, 128>}]} {
    %c0 = arith.constant 0 : index
    %c0_0 = arith.constant 0 : index
    %0 = vector.load %arg1[%c0, %c0_0] : memref<64x1xi32, #tpu.memory_space<vmem>>, vector<64x1xi32>
    %1 = tpu.iota {dimensions = array<i32: 1>} : vector<64x128xi32>
    %2 = vector.broadcast %0 : vector<64x1xi32> to vector<64x128xi32>
    %3 = arith.cmpi eq, %1, %2 : vector<64x128xi32>
    %4 = arith.extui %3 : vector<64x128xi1> to vector<64x128xi32>
    %5 = arith.sitofp %4 : vector<64x128xi32> to vector<64x128xf32>
    %6 = arith.truncf %5 : vector<64x128xf32> to vector<64x128xbf16>
    %c0_1 = arith.constant 0 : index
    %c0_2 = arith.constant 0 : index
    %7 = vector.load %arg2[%c0_1, %c0_2] : memref<128x32xbf16, #tpu.memory_space<vmem>>, vector<128x32xbf16>
    %cst = arith.constant dense<0.000000e+00> : vector<64x32xf32>
    %8 = tpu.matmul %6, %7, %cst {dimension_numbers = #tpu.dot_dimension_numbers<[1], [0], [0], [1], [0, 0, 1, 1], [], []>} : vector<64x128xbf16>, vector<128x32xbf16>, vector<64x32xf32> -> vector<64x32xf32>
    %9 = tpu.iota {dimensions = array<i32: 0>} : vector<64x1xi32>
    %c8_i32 = arith.constant 8 : i32
    %c0_i32 = arith.constant 0 : i32
    %10 = arith.cmpi eq, %c8_i32, %c0_i32 : i32
    %c1_i32 = arith.constant 1 : i32
    %11 = arith.select %10, %c1_i32, %c8_i32 : i32
    %12 = vector.broadcast %11 : i32 to vector<64x1xi32>
    %13 = arith.remsi %9, %12 : vector<64x1xi32>
    %c0_i32_3 = arith.constant 0 : i32
    %14 = vector.broadcast %c0_i32_3 : i32 to vector<64x1xi32>
    %15 = arith.cmpi ne, %13, %14 : vector<64x1xi32>
    %c0_i32_4 = arith.constant 0 : i32
    %16 = vector.broadcast %c0_i32_4 : i32 to vector<64x1xi32>
    %17 = arith.cmpi slt, %13, %16 : vector<64x1xi32>
    %c0_i32_5 = arith.constant 0 : i32
    %18 = arith.cmpi slt, %11, %c0_i32_5 : i32
    %19 = vector.broadcast %18 : i1 to vector<64x1xi1>
    %20 = vector.broadcast %19 : vector<64x1xi1> to vector<64x1xi1>
    %21 = arith.xori %17, %20 : vector<64x1xi1>
    %22 = arith.andi %21, %15 : vector<64x1xi1>
    %23 = vector.broadcast %11 : i32 to vector<64x1xi32>
    %24 = arith.addi %13, %23 : vector<64x1xi32>
    %25 = arith.select %22, %24, %13 : vector<64x1xi1>, vector<64x1xi32>
    %c1_i32_6 = arith.constant 1 : i32
    %26 = vector.broadcast %c1_i32_6 : i32 to vector<64x1xi32>
    %27 = arith.cmpi sge, %25, %26 : vector<64x1xi32>
    %c1_i32_7 = arith.constant 1 : i32
    %28 = tpu.dynamic_rotate %8 by %c1_i32_7 dim 0 : vector<64x32xf32>, i32 -> vector<64x32xf32>
    %cst_8 = arith.constant 0.000000e+00 : f32
    %29 = vector.shape_cast %27 : vector<64x1xi1> to vector<64x1xi1>
    %30 = vector.broadcast %29 : vector<64x1xi1> to vector<64x32xi1>
    %31 = vector.broadcast %cst_8 : f32 to vector<64x32xf32>
    %32 = arith.select %30, %28, %31 : vector<64x32xi1>, vector<64x32xf32>
    %c6_i32 = arith.constant 6 : i32
    %33 = vector.broadcast %c6_i32 : i32 to vector<64x1xi32>
    %34 = arith.cmpi sle, %25, %33 : vector<64x1xi32>
    %c63_i32 = arith.constant 63 : i32
    %35 = tpu.dynamic_rotate %8 by %c63_i32 dim 0 : vector<64x32xf32>, i32 -> vector<64x32xf32>
    %cst_9 = arith.constant 0.000000e+00 : f32
    %36 = vector.shape_cast %34 : vector<64x1xi1> to vector<64x1xi1>
    %37 = vector.broadcast %36 : vector<64x1xi1> to vector<64x32xi1>
    %38 = vector.broadcast %cst_9 : f32 to vector<64x32xf32>
    %39 = arith.select %37, %35, %38 : vector<64x32xi1>, vector<64x32xf32>
    %40 = tpu.concatenate %32, %8, %39 in 1 : vector<64x32xf32>, vector<64x32xf32>, vector<64x32xf32> -> vector<64x96xf32>
    %41 = arith.truncf %40 : vector<64x96xf32> to vector<64x96xbf16>
    %c0_10 = arith.constant 0 : index
    %c0_11 = arith.constant 0 : index
    %42 = vector.load %arg3[%c0_10, %c0_11] : memref<96x128xbf16, #tpu.memory_space<vmem>>, vector<96x128xbf16>
    %cst_12 = arith.constant dense<0.000000e+00> : vector<64x128xf32>
    %43 = tpu.matmul %41, %42, %cst_12 {dimension_numbers = #tpu.dot_dimension_numbers<[1], [0], [0], [1], [0, 0, 1, 1], [], []>} : vector<64x96xbf16>, vector<96x128xbf16>, vector<64x128xf32> -> vector<64x128xf32>
    %c0_13 = arith.constant 0 : index
    %c0_14 = arith.constant 0 : index
    %44 = vector.load %arg4[%c0_13, %c0_14] : memref<1x128xf32, #tpu.memory_space<vmem>>, vector<1x128xf32>
    %45 = vector.broadcast %44 : vector<1x128xf32> to vector<64x128xf32>
    %46 = arith.addf %43, %45 : vector<64x128xf32>
    %cst_15 = arith.constant 0.000000e+00 : f32
    %47 = vector.broadcast %cst_15 : f32 to vector<64x128xf32>
    %48 = arith.maximumf %46, %47 : vector<64x128xf32>
    %49 = vector.shape_cast %48 : vector<64x128xf32> to vector<8x8x128xf32>
    %cst_16 = arith.constant dense<0xFF800000> : vector<8x128xf32>
    %50 = vector.multi_reduction <maximumf>, %49, %cst_16 [1] : vector<8x8x128xf32> to vector<8x128xf32>
    %51 = arith.truncf %50 : vector<8x128xf32> to vector<8x128xbf16>
    %c0_17 = arith.constant 0 : index
    %c0_18 = arith.constant 0 : index
    %52 = vector.load %arg5[%c0_17, %c0_18] : memref<128x128xbf16, #tpu.memory_space<vmem>>, vector<128x128xbf16>
    %cst_19 = arith.constant dense<0.000000e+00> : vector<8x128xf32>
    %53 = tpu.matmul %51, %52, %cst_19 {dimension_numbers = #tpu.dot_dimension_numbers<[1], [0], [0], [1], [0, 0, 1, 1], [], []>} : vector<8x128xbf16>, vector<128x128xbf16>, vector<8x128xf32> -> vector<8x128xf32>
    %c0_20 = arith.constant 0 : index
    %c0_21 = arith.constant 0 : index
    %54 = vector.load %arg6[%c0_20, %c0_21] : memref<1x128xf32, #tpu.memory_space<vmem>>, vector<1x128xf32>
    %55 = vector.broadcast %54 : vector<1x128xf32> to vector<8x128xf32>
    %56 = arith.addf %53, %55 : vector<8x128xf32>
    %c0_22 = arith.constant 0 : index
    %c0_23 = arith.constant 0 : index
    %57 = vector.load %arg7[%c0_22, %c0_23] : memref<8x128xf32, #tpu.memory_space<vmem>>, vector<8x128xf32>
    tpu.vector_store %arg7[%c0_22, %c0_23], %56 {strides = array<i32>} : memref<8x128xf32, #tpu.memory_space<vmem>>, vector<8x128xf32>,
    return
  }
  func.func @transform_0(%arg0: i32) -> (i32, i32) {
    %c0_i32 = arith.constant 0 : i32
    %c0_i32_0 = arith.constant 0 : i32
    return %arg0, %c0_i32 : i32, i32
  }
  func.func @transform_1(%arg0: i32) -> (i32, i32) {
    %c0_i32 = arith.constant 0 : i32
    %c0_i32_0 = arith.constant 0 : i32
    %c0_i32_1 = arith.constant 0 : i32
    return %c0_i32, %c0_i32_0 : i32, i32
  }
  func.func @transform_2(%arg0: i32) -> (i32, i32) {
    %c0_i32 = arith.constant 0 : i32
    %c0_i32_0 = arith.constant 0 : i32
    %c0_i32_1 = arith.constant 0 : i32
    return %c0_i32, %c0_i32_0 : i32, i32
  }
  func.func @transform_3(%arg0: i32) -> (i32, i32) {
    %c0_i32 = arith.constant 0 : i32
    %c0_i32_0 = arith.constant 0 : i32
    %c0_i32_1 = arith.constant 0 : i32
    return %c0_i32, %c0_i32_0 : i32, i32
  }
  func.func @transform_4(%arg0: i32) -> (i32, i32) {
    %c0_i32 = arith.constant 0 : i32
    %c0_i32_0 = arith.constant 0 : i32
    %c0_i32_1 = arith.constant 0 : i32
    return %c0_i32, %c0_i32_0 : i32, i32
  }
  func.func @transform_5(%arg0: i32) -> (i32, i32) {
    %c0_i32 = arith.constant 0 : i32
    %c0_i32_0 = arith.constant 0 : i32
    %c0_i32_1 = arith.constant 0 : i32
    return %c0_i32, %c0_i32_0 : i32, i32
  }
  func.func @transform_6(%arg0: i32) -> (i32, i32) {
    %c0_i32 = arith.constant 0 : i32
    %c0_i32_0 = arith.constant 0 : i32
    return %arg0, %c0_i32 : i32, i32
  }
}

</mosaic_0001>

<bundles_post_ra>
// kernel: tpu_custom_call.1
= control target key start
LH: loop header
LB: loop body
LE: loop exit
PB: predicated region body
PF: predicated region fallthrough
CT: control target
= control target key end

     0   :  { %v1094_v2 = vmov 0   ;;  %s1462_s0 = inlined_call_operand.vmem [shape: s32[64,1], index: 0, kind: input, shape index: {}]   ;;  %s1463_s1 = inlined_call_operand.vmem [shape: bf16[128,32], index: 1, kind: input, shape index: {}]   ;;  %s1464_s2 = inlined_call_operand.vmem [shape: bf16[96,128], index: 2, kind: input, shape index: {}]   ;;  %s1465_s3 = inlined_call_operand.vmem [shape: f32[1,128], index: 3, kind: input, shape index: {}]   ;;  %s1466_s4 = inlined_call_operand.vmem [shape: bf16[128,128], index: 4, kind: input, shape index: {}]   ;;  %s1467_s5 = inlined_call_operand.vmem [shape: f32[1,128], index: 5, kind: input, shape index: {}]   ;;  %s1468_s6 = inlined_call_operand.hbm [shape: f32[8,128], index: 6, kind: output, shape index: {}]  }
   0x1   :  { %v27_v0 = vld [vmem:[%s1462_s0 + $0x10] sm:$0xff]  ;;  %v25_v1 = vld [vmem:[%s1462_s0] sm:$0xff]  ;;  %1007 = vset.pattern.permute.xlu1 %v1094_v2  ;;  %1006 = vset.pattern.permute.xlu0 %v1094_v2  ;;  %v28_v3 = vld [vmem:[%s1462_s0 + $0x18] sm:$0xff] }
   0x2   :  { %42 = vperm.xlu1 %1007, %v27_v0   ;;  %36 = vperm.xlu0 %1006, %v25_v1   ;;  %v26_v4 = vld [vmem:[%s1462_s0 + $0x8] sm:$0xff]  ;;  %v1048_v5 = vld [vmem:[%s1463_s1] sm:$0xff]   ;;  %v1050_v9 = vld [vmem:[%s1463_s1 + $0x10] sm:$0xff]  }
   0x3   :  { %v1049_v6 = vld [vmem:[%s1463_s1 + $0x8] sm:$0xff]   ;;  %935 = vmatprep.subr.bf16.mxu0 %v1048_v5  ;;  %v29_v8 = vld [vmem:[%s1462_s0 + $0x20] sm:$0xff]  ;;  %v32_v10 = vld [vmem:[%s1462_s0 + $0x38] sm:$0xff] }
   0x4   :  { %v30_v7 = vld [vmem:[%s1462_s0 + $0x28] sm:$0xff]  ;;  %936 = vmatpush3.bf16.msra.mxu0 %v1048_v5  ;;  %v31_v11 = vld [vmem:[%s1462_s0 + $0x30] sm:$0xff]  ;;  %v1051_v12 = vld [vmem:[%s1463_s1 + $0x18] sm:$0xff]  }
   0x5   :  { %937 = vmatprep.subr.bf16.mxu0 %v1049_v6  ;;  %v1052_v13 = vld [vmem:[%s1463_s1 + $0x20] sm:$0xff]   ;;  %v1053_v14 = vld [vmem:[%s1463_s1 + $0x28] sm:$0xff]  }
   0x6   :  { %45 = vperm.xlu1 %1007, %v28_v3   ;;  %39 = vperm.xlu0 %1006, %v26_v4  }
   0x8   :  { %938 = vmatpush3.bf16.msra.mxu0 %v1049_v6 }
   0x9   :  { %939 = vmatprep.subr.bf16.mxu0 %v1050_v9 }
   0xa   :  { %51 = vperm.xlu1 %1007, %v30_v7   ;;  %48 = vperm.xlu0 %1006, %v29_v8  }
   0xc   :  { %940 = vmatpush3.bf16.msra.mxu0 %v1050_v9 }
   0xd   :  { %941 = vmatprep.subr.bf16.mxu0 %v1051_v12 }
   0xe   :  { %57 = vperm.xlu1 %1007, %v32_v10   ;;  %54 = vperm.xlu0 %1006, %v31_v11  }
  0x10   :  { %942 = vmatpush3.bf16.msra.mxu0 %v1051_v12 }
  0x11   :  { %943 = vmatprep.subr.bf16.mxu0 %v1052_v13 }
  0x12   :  { %11 = vsyncpa [#allocation3], 0  ;;  %v1054_v15 = vld [vmem:[%s1463_s1 + $0x30] sm:$0xff]   ;;  %v1055_v16 = vld [vmem:[%s1463_s1 + $0x38] sm:$0xff]   ;;  %v33_v17 = vlaneseq  ;;  %v1095_v23 = vmov 1.0|1.0  }
  0x13   :  { %v1056_v28 = vld [vmem:[%s1464_s2] sm:$0xff]   ;;  %v1057_v29 = vld [vmem:[%s1464_s2 + $0x8] sm:$0xff]   ;;  %v1058_v32 = vld [vmem:[%s1464_s2 + $0x10] sm:$0xff]   ;;  %s1096_s13 = smov 32   ;;  %s1100_s8 = smov [#allocation2]  }
  0x14   :  { %944 = vmatpush3.bf16.msra.mxu0 %v1052_v13  ;;  %v34_v20 = vand.u32 127, %v33_v17  ;;  %959 = vmatprep.subr.bf16.mxu1 %v1056_v28  ;;  %v1190_v30 = vshrl.u32 %v33_v17, 7  ;;  %v1059_v35 = vld [vmem:[%s1464_s2 + $0x18] sm:$0xff]   ;;  %v1060_v42 = vld [vmem:[%s1464_s2 + $0x20] sm:$0xff]   ;;  %v1063_v6 = vld [vmem:[%s1466_s4 + $0x8] sm:$0xff]   ;;  %s852_s9 = sshll.u32 %s1100_s8, 4  ;;  %s853_s9 = int_to_ptr.vmem [resolvable:$true] %s852_s9 }
  0x15   :  { %945 = vmatprep.subr.bf16.mxu0 %v1053_v14  ;;  %960 = vmatpush3.bf16.msra.mxu1 %v1056_v28  ;;  %s1070_s10 = scalar_lea.vmem %s853_s9, 128  ;;  %p1075_p1 = scmp.lt.s32.totalorder %s853_s9, %s853_s9 }
  0x16   :  { %961 = vmatprep.subr.bf16.mxu1 %v1057_v29  ;;  %v219_v31 = vadd.s32 16, %v1190_v30  ;;  %v218_v33 = vadd.s32 8, %v1190_v30  ;;  %v220_v34 = vadd.s32 24, %v1190_v30  ;;  %v1202_v36 = vadd.s32 40, %v1190_v30  ;;  %p1071_p0 = scmp.ne.s32.totalorder %s853_s9, %s1070_s10  ;;  %p1076_p2 = scmp.lt.s32.totalorder %s1070_s10, %s1070_s10 }
  0x17   :  { %v223_v37 = vadd.s32 48, %v1190_v30  ;;  %v229_v39 = vand.u32 7, %v1190_v30  ;;  %v221_v43 = vadd.s32 32, %v1190_v30  ;;  %v1211_v44 = vadd.s32 56, %v1190_v30 }
  0x18   :  { %946 = vmatpush3.bf16.msra.mxu0 %v1053_v14  ;;  %v243_v38 = vand.u32 7, %v219_v31  ;;  %v236_v40 = vand.u32 7, %v218_v33  ;;  %v250_v41 = vand.u32 7, %v220_v34  ;;  %vm337_vm12 = vcmp.lt.s32.totalorder %v1190_v30, 1  ;;  %p1077_p3 = por %p1076_p2, %p1075_p1 }
  0x19   :  { %947 = vmatprep.subr.bf16.mxu0 %v1054_v15  ;;  %962 = vmatpush3.bf16.msra.mxu1 %v1057_v29  ;;  %vm386_vm13 = vcmp.lt.s32.totalorder %v1190_v30, 7  ;;  %v264_v46 = vand.u32 7, %v1202_v36  ;;  %v271_v47 = vand.u32 7, %v223_v37  ;;  %vm1222_vm15 = vcmp.le.s32.totalorder %v229_v39, 6 }
  0x1a   :  { %963 = vmatprep.subr.bf16.mxu1 %v1058_v32  ;;  %vm1216_vm14 = vcmp.le.s32.totalorder %v243_v38, 6  ;;  %v257_v56 = vand.u32 7, %v221_v43  ;;  %v278_v57 = vand.u32 7, %v1211_v44  ;;  %p1078_p4 = pnand %p1077_p3, %p1071_p0 }
  0x1c   :  { %948 = vmatpush3.bf16.msra.mxu0 %v1054_v15  ;;  %v1061_v15 = vld [vmem:[%s1464_s2 + $0x28] sm:$0xff]   ;;  %s1097_s2 = smov 64  }
  0x1d   :  { %949 = vmatprep.subr.bf16.mxu0 %v1055_v16  ;;  %964 = vmatpush3.bf16.msra.mxu1 %v1058_v32 }
  0x1e   :  { %965 = vmatprep.subr.bf16.mxu1 %v1059_v35 }
  0x20   :  { %950 = vmatpush3.bf16.msra.mxu0 %v1055_v16 }
  0x21   :  { %966 = vmatpush3.bf16.msra.mxu1 %v1059_v35 }
  0x22   :  { %967 = vmatprep.subr.bf16.mxu1 %v1060_v42 }
  0x25   :  { %968 = vmatpush3.bf16.msra.mxu1 %v1060_v42 }
  0x26   :  { %969 = vmatprep.subr.bf16.mxu1 %v1061_v15 }
  0x29   :  { %970 = vmatpush3.bf16.msra.mxu1 %v1061_v15 }
  0x81   :  { %v43_v18 = vpop.permute.xlu1 %42  ;;  %v37_v19 = vpop.permute.xlu0 %36 }
  0x82   :  { %vm61_vm0 = vcmp.eq.s32.totalorder %v34_v20, %v43_v18  ;;  %vm59_vm3 = vcmp.eq.s32.totalorder %v34_v20, %v37_v19 }
  0x85   :  { %v46_v21 = vpop.permute.xlu1 %45  ;;  %v40_v22 = vpop.permute.xlu0 %39 }
  0x86   :  { %vm62_vm1 = vcmp.eq.s32.totalorder %v34_v20, %v46_v21  ;;  %vm60_vm2 = vcmp.eq.s32.totalorder %v34_v20, %v40_v22 }
  0x87   :  { %vm878_vm4 = vmpackc.low %vm62_vm1, %vm61_vm0  ;;  %vm1226_vm0 = vcmp.le.s32.totalorder %v236_v40, 6  ;;  %vm1230_vm1 = vcmp.ge.s32.totalorder %v243_v38, 1 }
  0x88   :  { %vm876_vm5 = vmpackc.low %vm60_vm2, %vm59_vm3  ;;  %vm1234_vm2 = vcmp.ge.s32.totalorder %v250_v41, 1  ;;  %vm1241_vm3 = vcmp.ge.s32.totalorder %v236_v40, 1 }
  0x89   :  { %951 = vmatprep.mubr.msk.bf16.mxu0 %vm876_vm5, %v1095_v23  ;;  %v52_v24 = vpop.permute.xlu1 %51  ;;  %v49_v25 = vpop.permute.xlu0 %48  ;;  %vm1254_vm5 = vcmp.ge.s32.totalorder %v264_v46, 1 }
  0x8a   :  { %vm64_vm6 = vcmp.eq.s32.totalorder %v34_v20, %v52_v24  ;;  %952 = vmatmul.mubr.msk.bf16.vlgmr.msra.gmra.mrb[0].mxu0 %vm878_vm4, %v1095_v23  ;;  %vm63_vm7 = vcmp.eq.s32.totalorder %v34_v20, %v49_v25  ;;  %vm1248_vm4 = vcmp.le.s32.totalorder %v250_v41, 6 }
  0x8b   :  { %vm880_vm8 = vmpackc.low %vm64_vm6, %vm63_vm7  ;;  %vm1258_vm6 = vcmp.ge.s32.totalorder %v271_v47, 1  ;;  %vm1270_vm7 = vcmp.le.s32.totalorder %v271_v47, 6 }
  0x8c   :  { %955 = vmatprep.mubr.msk.bf16.mxu0 %vm880_vm8, %v1095_v23  ;;  %vm1298_vm8 = vcmp.le.s32.totalorder %v278_v57, 6 }
  0x8d   :  { %v58_v26 = vpop.permute.xlu1 %57  ;;  %v55_v27 = vpop.permute.xlu0 %54 }
  0x8e   :  { %vm66_vm9 = vcmp.eq.s32.totalorder %v34_v20, %v58_v26  ;;  %vm65_vm10 = vcmp.eq.s32.totalorder %v34_v20, %v55_v27 }
  0x8f   :  { %vm882_vm11 = vmpackc.low %vm66_vm9, %vm65_vm10  ;;  %vm1302_vm9 = vcmp.ge.s32.totalorder %v257_v56, 1  ;;  %vm1312_vm10 = vcmp.le.s32.totalorder %v257_v56, 6 }
  0x92   :  { %956 = vmatmul.mubr.msk.bf16.gmra.mrb[4].mxu0 %vm882_vm11, %v1095_v23  ;;  %vm1316_vm11 = vcmp.le.s32.totalorder %v264_v46, 6 }
 0x15d   :  { %v953_v45 = vpop.f32.mrb[0].mxu0 }
 0x15e   :  { %v1220_v49 = vpop.f32.mrb[1].mxu0  ;;  %v331_v54 = vrot.slane %v953_v45, 7  ;;  %v380_v59 = vrot.slane %v953_v45, 1 }
 0x15f   :  { %v1238_v55 = vpop.f32.mrb[2].mxu0  ;;  %v378_v1 = vrot.slane %v1220_v49, 1  ;;  %v329_v7 = vrot.slane %v1220_v49, 7 }
 0x160   :  { %v1008_v60 = vpack.i.bf16 %v1238_v55, %v953_v45  ;;  %v332_v61 = vrot.slane %v1238_v55, 7  ;;  %v381_v62 = vrot.slane %v1238_v55, 1  ;;  %v188_v63 = vpop.f32.mrb[3].mxu0 }
 0x161   :  { %v1013_v2 = vpack.i.bf16 %v188_v63, %v1220_v49  ;;  %v330_v3 = vrot.slane %v188_v63, 7  ;;  %v379_v4 = vrot.slane %v188_v63, 1 }
 0x162   :  { %v1265_v8 = vsel %vm337_vm12, %v331_v54, %v332_v61  ;;  %1009 = vrot.lane.b32.xlu1 %v1008_v60, %s1096_s13  ;;  %v391_v9 = vsel %vm386_vm13, %v380_v59, %v381_v62 }
 0x163   :  { %v1276_v11 = vsel %vm337_vm12, %v330_v3, %v331_v54  ;;  %1014 = vrot.lane.b32.xlu0 %v1013_v2, %s1096_s13  ;;  %v392_v12 = vsel %vm386_vm13, %v379_v4, %v380_v59  ;;  %v393_v13 = vsel %vm386_vm13, %v378_v1, %v379_v4  ;;  %v413_v14 = vsel %vm1216_vm14, %v391_v9, 0.0 }
 0x164   :  { %v411_v16 = vsel %vm1222_vm15, %v393_v13, 0.0  ;;  %v412_v17 = vsel %vm1226_vm0, %v392_v12, 0.0  ;;  %v364_v18 = vsel %vm1230_vm1, %v1276_v11, 0.0  ;;  %v365_v19 = vsel %vm1234_vm2, %v1265_v8, 0.0 }
 0x165   :  { %v957_v20 = vpop.f32.mrb[4].mxu0  ;;  %v1018_v21 = vpack.i.bf16 %v412_v17, %v411_v16  ;;  %v1310_v24 = vsel %vm337_vm12, %v329_v7, %v330_v3  ;;  %vm1320_vm14 = vcmp.ge.s32.totalorder %v229_v39, 1  ;;  %vm1328_vm15 = vcmp.ge.s32.totalorder %v278_v57, 1 }
 0x166   :  { %v201_v25 = vpop.f32.mrb[5].mxu0  ;;  %v363_v29 = vsel %vm1241_vm3, %v1310_v24, 0.0  ;;  %v335_v31 = vrot.slane %v957_v20, 7  ;;  %v384_v36 = vrot.slane %v957_v20, 1  ;;  %vm492_vm0 = vcmask 523264  }
 0x167   :  { %v333_v32 = vrot.slane %v201_v25, 7  ;;  %v382_v33 = vrot.slane %v201_v25, 1  ;;  %1019 = vrot.lane.b32.xlu0 %v1018_v21, %s1097_s2  ;;  %v958_v34 = vpop.f32.mrb[6].mxu0  ;;  %vm1099_vm1 = vmmov 0   ;;  %vm741_vm2 = vcmask 1041409  }
 0x168   :  { %v1033_v37 = vpack.i.bf16 %v958_v34, %v957_v20  ;;  %v336_v38 = vrot.slane %v958_v34, 7  ;;  %v385_v39 = vrot.slane %v958_v34, 1  ;;  %v204_v40 = vpop.f32.mrb[7].mxu0  ;;  %vm743_vm3 = vcmask 1042434  }
 0x169   :  { %v1334_v41 = vsel %vm337_vm12, %v332_v61, %v333_v32  ;;  %v1023_v42 = vpack.i.bf16 %v204_v40, %v201_v25  ;;  %v334_v43 = vrot.slane %v204_v40, 7  ;;  %v383_v44 = vrot.slane %v204_v40, 1 }
 0x16a   :  { %v1338_v45 = vsel %vm337_vm12, %v335_v31, %v336_v38  ;;  %v390_v46 = vsel %vm386_vm13, %v381_v62, %v382_v33  ;;  %v387_v47 = vsel %vm386_vm13, %v384_v36, %v385_v39  ;;  %v394_v48 = vsel %vm386_vm13, %v385_v39, %v378_v1 }
 0x16b   :  { %v1348_v50 = vsel %vm337_vm12, %v334_v43, %v335_v31  ;;  %v340_v51 = vsel %vm337_vm12, %v333_v32, %v334_v43  ;;  %1024 = vrot.lane.b32.xlu0 %v1023_v42, %s1096_s13  ;;  %v414_v54 = vsel %vm1248_vm4, %v390_v46, 0.0  ;;  %v388_v55 = vsel %vm386_vm13, %v383_v44, %v384_v36 }
 0x16c   :  { %v367_v56 = vsel %vm1254_vm5, %v340_v51, 0.0  ;;  %v368_v57 = vsel %vm1258_vm6, %v1348_v50, 0.0  ;;  %v1028_v58 = vpack.i.bf16 %v414_v54, %v413_v14  ;;  %v389_v59 = vsel %vm386_vm13, %v382_v33, %v383_v44  ;;  %v1064_v50 = vld [vmem:[%s1466_s4 + $0x10] sm:$0xff]   ;;  %v1065_v54 = vld [vmem:[%s1466_s4 + $0x18] sm:$0xff]  }
 0x16d   :  { %v415_v60 = vsel %vm1312_vm10, %v389_v59, 0.0  ;;  %v416_v61 = vsel %vm1316_vm11, %v388_v55, 0.0  ;;  %v417_v62 = vsel %vm1270_vm7, %v387_v47, 0.0  ;;  %v418_v63 = vsel %vm1298_vm8, %v394_v48, 0.0  ;;  %v1062_v48 = vld [vmem:[%s1466_s4] sm:$0xff]  }
 0x16e   :  { %1029 = vrot.lane.b32.xlu1 %v1028_v58, %s1097_s2  ;;  %v1038_v0 = vpack.i.bf16 %v416_v61, %v415_v60  ;;  %v1043_v1 = vpack.i.bf16 %v418_v63, %v417_v62  ;;  %v366_v2 = vsel %vm1302_vm9, %v1334_v41, 0.0  ;;  %v345_v3 = vsel %vm337_vm12, %v336_v38, %v329_v7  ;;  %v1066_v55 = vld [vmem:[%s1466_s4 + $0x20] sm:$0xff]   ;;  %v1069_v58 = vld [vmem:[%s1466_s4 + $0x38] sm:$0xff]  }
 0x16f   :  { %v362_v4 = vsel %vm1320_vm14, %v345_v3, 0.0  ;;  %v369_v5 = vsel %vm1328_vm15, %v1338_v45, 0.0  ;;  %vm483_vm13 = vcmask 261120   ;;  %vm560_vm12 = vcmask 785408   ;;  %v884_v59 = vld [vmem:[%s1465_s3] ss:$0 sm:$0xff] }
 0x170   :  { %1039 = vrot.lane.b32.xlu0 %v1038_v0, %s1097_s2  ;;  %v1098_v51 = vmov 0.0   ;;  %vm745_vm4 = vcmask 1043459   ;;  %vm747_vm5 = vcmask 1044484   ;;  %vm749_vm6 = vcmask 1045509  }
 0x171   :  { %979 = vmatprep.subr.bf16.mxu1 %v1098_v51  ;;  %vm751_vm7 = vcmask 1046534   ;;  %vm753_vm8 = vcmask 1047559  }
 0x172   :  { %1034 = vrot.lane.b32.xlu1 %v1033_v37, %s1096_s13 }
 0x176   :  { %1044 = vrot.lane.b32.xlu1 %v1043_v1, %s1097_s2 }
 0x1d4   :  { %v1010_v13 = vpop.permute.xlu1 %1009 }
 0x1d5   :  { %v1015_v9 = vpop.permute.xlu0 %1014  ;;  %v1012_v22 = vunpack.i.h.bf16 %v1010_v13  ;;  %v1011_v23 = vunpack.i.l.bf16 %v1010_v13 }
 0x1d6   :  { %v1017_v10 = vunpack.i.h.bf16 %v1015_v9  ;;  %v1016_v12 = vunpack.i.l.bf16 %v1015_v9 }
 0x1d7   :  { %v487_v31 = vsel %vm483_vm13, %v365_v19, %v1012_v22 }
 0x1d8   :  { %v484_v14 = vsel %vm483_vm13, %v362_v4, %v1016_v12  ;;  %v485_v15 = vsel %vm483_vm13, %v363_v29, %v1017_v10  ;;  %v486_v29 = vsel %vm483_vm13, %v364_v18, %v1011_v23 }
 0x1d9   :  { %v1020_v49 = vpop.permute.xlu0 %1019 }
 0x1da   :  { %v1022_v30 = vunpack.i.h.bf16 %v1020_v49  ;;  %v1021_v7 = vunpack.i.l.bf16 %v1020_v49 }
 0x1dc   :  { %v493_v16 = vsel %vm492_vm0, %v484_v14, %v1021_v7  ;;  %v494_v17 = vsel %vm492_vm0, %v485_v15, %v1022_v30 }
 0x1dd   :  { %v1025_v20 = vpop.permute.xlu0 %1024  ;;  %v501_v21 = vpack.c.bf16 %v494_v17, %v493_v16 }
 0x1de   :  { %v1027_v24 = vunpack.i.h.bf16 %v1025_v20  ;;  %v1026_v25 = vunpack.i.l.bf16 %v1025_v20 }
 0x1df   :  { %971 = vmatprep.mubr.msk.bf16.mxu1 %vm560_vm12, %v501_v21 }
 0x1e0   :  { %v1030_v26 = vpop.permute.xlu1 %1029  ;;  %v489_v37 = vsel %vm483_vm13, %v367_v56, %v1027_v24  ;;  %v488_v52 = vsel %vm483_vm13, %v366_v2, %v1026_v25  ;;  %v1067_v56 = vld [vmem:[%s1466_s4 + $0x28] sm:$0xff]  }
 0x1e1   :  { %v1032_v27 = vunpack.i.h.bf16 %v1030_v26  ;;  %v1031_v28 = vunpack.i.l.bf16 %v1030_v26 }
 0x1e2   :  { %v1040_v32 = vpop.permute.xlu0 %1039 }
 0x1e3   :  { %v496_v33 = vsel %vm492_vm0, %v487_v31, %v1032_v27  ;;  %v495_v34 = vsel %vm492_vm0, %v486_v29, %v1031_v28  ;;  %v1042_v35 = vunpack.i.h.bf16 %v1040_v32  ;;  %v1041_v36 = vunpack.i.l.bf16 %v1040_v32 }
 0x1e4   :  { %v502_v11 = vpack.c.bf16 %v496_v33, %v495_v34  ;;  %v1035_v38 = vpop.permute.xlu1 %1034 }
 0x1e5   :  { %v497_v18 = vsel %vm492_vm0, %v488_v52, %v1041_v36  ;;  %v498_v53 = vsel %vm492_vm0, %v489_v37, %v1042_v35  ;;  %v1037_v39 = vunpack.i.h.bf16 %v1035_v38  ;;  %v1036_v19 = vunpack.i.l.bf16 %v1035_v38 }
 0x1e6   :  { %v503_v8 = vpack.c.bf16 %v498_v53, %v497_v18  ;;  %972 = vmatmul.mubr.msk.bf16.vlgmr.msra.gmra.mrb[0].mxu1 %vm560_vm12, %v502_v11 }
 0x1e7   :  { %v490_v43 = vsel %vm483_vm13, %v368_v57, %v1036_v19  ;;  %v491_v44 = vsel %vm483_vm13, %v369_v5, %v1037_v39  ;;  %980 = vmatpush3.bf16.msra.mxu1 %v1062_v48  ;;  %v1068_v57 = vld [vmem:[%s1466_s4 + $0x30] sm:$0xff]  }
 0x1e8   :  { %v1045_v40 = vpop.permute.xlu1 %1044  ;;  %975 = vmatprep.mubr.msk.bf16.mxu1 %vm560_vm12, %v503_v8  ;;  %981 = vmatprep.subr.bf16.mxu1 %v1098_v51 }
 0x1e9   :  { %v1047_v41 = vunpack.i.h.bf16 %v1045_v40  ;;  %v1046_v42 = vunpack.i.l.bf16 %v1045_v40 }
 0x1eb   :  { %v499_v45 = vsel %vm492_vm0, %v490_v43, %v1046_v42  ;;  %v500_v46 = vsel %vm492_vm0, %v491_v44, %v1047_v41  ;;  %982 = vmatpush3.bf16.msra.mxu1 %v1063_v6 }
 0x1ec   :  { %v504_v47 = vpack.c.bf16 %v500_v46, %v499_v45  ;;  %983 = vmatprep.subr.bf16.mxu1 %v1098_v51 }
 0x1ee   :  { %976 = vmatmul.mubr.msk.bf16.gmra.mrb[4].mxu1 %vm560_vm12, %v504_v47 }
 0x1ef   :  { %984 = vmatpush3.bf16.msra.mxu1 %v1064_v50  ;;  %995 = vmatprep.mubr.msk.bf16.mxu1 %vm1099_vm1, %v1098_v51 }
 0x1f0   :  { %985 = vmatprep.subr.bf16.mxu1 %v1098_v51 }
 0x1f3   :  { %986 = vmatpush3.bf16.msra.mxu1 %v1065_v54 }
 0x1f4   :  { %987 = vmatprep.subr.bf16.mxu1 %v1098_v51 }
 0x1f7   :  { %988 = vmatpush3.bf16.msra.mxu1 %v1066_v55 }
 0x1f8   :  { %989 = vmatprep.subr.bf16.mxu1 %v1098_v51 }
 0x1fb   :  { %990 = vmatpush3.bf16.msra.mxu1 %v1067_v56 }
 0x1fc   :  { %991 = vmatprep.subr.bf16.mxu1 %v1098_v51 }
 0x1ff   :  { %992 = vmatpush3.bf16.msra.mxu1 %v1068_v57 }
 0x200   :  { %993 = vmatprep.subr.bf16.mxu1 %v1098_v51 }
 0x203   :  { %994 = vmatpush3.bf16.msra.mxu1 %v1069_v58 }
 0x2b9   :  { %v973_v60 = vpop.f32.mrb[0].mxu1 }
 0x2ba   :  { %v616_v61 = vadd.f32 %v973_v60, %v884_v59  ;;  %v607_v62 = vpop.f32.mrb[1].mxu1 }
 0x2bb   :  { %v608_v63 = vadd.f32 %v884_v59, %v607_v62  ;;  %v974_v0 = vpop.f32.mrb[2].mxu1 }
 0x2bc   :  { %v640_v1 = vmax.f32 %v616_v61, 0.0  ;;  %v619_v2 = vadd.f32 %v974_v0, %v884_v59  ;;  %v610_v3 = vpop.f32.mrb[3].mxu1 }
 0x2bd   :  { %v638_v4 = vmax.f32 %v608_v63, 0.0  ;;  %v611_v5 = vadd.f32 %v884_v59, %v610_v3 }
 0x2be   :  { %v658_v9 = vrot.slane %v640_v1, 4  ;;  %v641_v10 = vmax.f32 %v619_v2, 0.0 }
 0x2bf   :  { %v646_v12 = vrot.slane %v638_v4, 4  ;;  %v639_v49 = vmax.f32 %v611_v5, 0.0 }
 0x2c0   :  { %v659_v30 = vmax.f32 %v640_v1, %v658_v9  ;;  %v664_v7 = vrot.slane %v641_v10, 4 }
 0x2c1   :  { %v647_v13 = vmax.f32 %v638_v4, %v646_v12  ;;  %v652_v14 = vrot.slane %v639_v49, 4  ;;  %v977_v15 = vpop.f32.mrb[4].mxu1 }
 0x2c2   :  { %v660_v16 = vrot.slane %v659_v30, 2  ;;  %v665_v17 = vmax.f32 %v641_v10, %v664_v7  ;;  %v632_v20 = vadd.f32 %v977_v15, %v884_v59  ;;  %v623_v21 = vpop.f32.mrb[5].mxu1 }
 0x2c3   :  { %v648_v22 = vrot.slane %v647_v13, 2  ;;  %v653_v23 = vmax.f32 %v639_v49, %v652_v14  ;;  %v624_v24 = vadd.f32 %v884_v59, %v623_v21  ;;  %v978_v25 = vpop.f32.mrb[6].mxu1 }
 0x2c4   :  { %v661_v26 = vmax.f32 %v659_v30, %v660_v16  ;;  %v666_v27 = vrot.slane %v665_v17, 2  ;;  %v644_v28 = vmax.f32 %v632_v20, 0.0  ;;  %v635_v29 = vadd.f32 %v978_v25, %v884_v59  ;;  %v626_v31 = vpop.f32.mrb[7].mxu1 }
 0x2c5   :  { %v649_v32 = vmax.f32 %v647_v13, %v648_v22  ;;  %v654_v33 = vrot.slane %v653_v23, 2  ;;  %v642_v34 = vmax.f32 %v624_v24, 0.0  ;;  %v627_v35 = vadd.f32 %v884_v59, %v626_v31 }
 0x2c6   :  { %v662_v36 = vrot.slane %v661_v26, 1  ;;  %v667_v37 = vmax.f32 %v665_v17, %v666_v27  ;;  %v682_v52 = vrot.slane %v644_v28, 4  ;;  %v645_v11 = vmax.f32 %v635_v29, 0.0 }
 0x2c7   :  { %v650_v38 = vrot.slane %v649_v32, 1  ;;  %v655_v18 = vmax.f32 %v653_v23, %v654_v33  ;;  %v670_v53 = vrot.slane %v642_v34, 4  ;;  %v643_v8 = vmax.f32 %v627_v35, 0.0 }
 0x2c8   :  { %v663_v39 = vmax.f32 %v661_v26, %v662_v36  ;;  %v668_v19 = vrot.slane %v667_v37, 1  ;;  %v683_v40 = vmax.f32 %v644_v28, %v682_v52  ;;  %v688_v41 = vrot.slane %v645_v11, 4 }
 0x2c9   :  { %v651_v42 = vmax.f32 %v649_v32, %v650_v38  ;;  %v656_v43 = vrot.slane %v655_v18, 1  ;;  %v671_v44 = vmax.f32 %v642_v34, %v670_v53  ;;  %v676_v45 = vrot.slane %v643_v8, 4  ;;  %v895_v32 = vld [vmem:[%s1467_s5] ss:$0 sm:$0xff] }
 0x2ca   :  { %v669_v46 = vmax.f32 %v667_v37, %v668_v19  ;;  %v684_v47 = vrot.slane %v683_v40, 2  ;;  %v689_v48 = vmax.f32 %v645_v11, %v688_v41  ;;  %v696_v55 = vpack.c.bf16 %v663_v39, %v663_v39 }
 0x2cb   :  { %v694_v51 = vpack.c.bf16 %v651_v42, %v651_v42  ;;  %v657_v6 = vmax.f32 %v655_v18, %v656_v43  ;;  %v672_v50 = vrot.slane %v671_v44, 2  ;;  %v677_v54 = vmax.f32 %v643_v8, %v676_v45 }
 0x2cc   :  { %v685_v56 = vmax.f32 %v683_v40, %v684_v47  ;;  %v690_v57 = vrot.slane %v689_v48, 2  ;;  %v697_v58 = vpack.c.bf16 %v669_v46, %v669_v46  ;;  %v735_v4 = vunpack.c.l.b16 %v696_v55 }
 0x2cd   :  { %v695_v59 = vpack.c.bf16 %v657_v6, %v657_v6  ;;  %v673_v60 = vmax.f32 %v671_v44, %v672_v50  ;;  %v678_v61 = vrot.slane %v677_v54, 2  ;;  %v733_v0 = vunpack.c.l.b16 %v694_v51 }
 0x2ce   :  { %v686_v62 = vrot.slane %v685_v56, 1  ;;  %v691_v63 = vmax.f32 %v689_v48, %v690_v57  ;;  %v736_v10 = vunpack.c.l.b16 %v697_v58 }
 0x2cf   :  { %v734_v1 = vunpack.c.l.b16 %v695_v59  ;;  %v674_v2 = vrot.slane %v673_v60, 1  ;;  %v679_v3 = vmax.f32 %v677_v54, %v678_v61 }
 0x2d0   :  { %v687_v5 = vmax.f32 %v685_v56, %v686_v62  ;;  %v692_v9 = vrot.slane %v691_v63, 1 }
 0x2d1   :  { %v742_v12 = vsel %vm741_vm2, %v734_v1, %v733_v0  ;;  %v675_v49 = vmax.f32 %v673_v60, %v674_v2  ;;  %v680_v30 = vrot.slane %v679_v3, 1 }
 0x2d2   :  { %v744_v7 = vsel %vm743_vm3, %v735_v4, %v742_v12  ;;  %v693_v13 = vmax.f32 %v691_v63, %v692_v9  ;;  %v700_v17 = vpack.c.bf16 %v687_v5, %v687_v5 }
 0x2d3   :  { %v698_v14 = vpack.c.bf16 %v675_v49, %v675_v49  ;;  %v746_v15 = vsel %vm745_vm4, %v736_v10, %v744_v7  ;;  %v681_v16 = vmax.f32 %v679_v3, %v680_v30 }
 0x2d4   :  { %v701_v21 = vpack.c.bf16 %v693_v13, %v693_v13  ;;  %v739_v25 = vunpack.c.l.b16 %v700_v17 }
 0x2d5   :  { %v737_v20 = vunpack.c.l.b16 %v698_v14  ;;  %v699_v22 = vpack.c.bf16 %v681_v16, %v681_v16 }
 0x2d6   :  { %v740_v26 = vunpack.c.l.b16 %v701_v21 }
 0x2d7   :  { %v748_v23 = vsel %vm747_vm5, %v737_v20, %v746_v15  ;;  %v738_v24 = vunpack.c.l.b16 %v699_v22 }
 0x2d9   :  { %v750_v27 = vsel %vm749_vm6, %v738_v24, %v748_v23 }
 0x2da   :  { %v752_v28 = vsel %vm751_vm7, %v739_v25, %v750_v27 }
 0x2db   :  { %v754_v29 = vsel %vm753_vm8, %v740_v26, %v752_v28 }
 0x2dc   :  { %v755_v31 = vpack.c.b16 %v754_v29, %v754_v29 }
 0x2de   :  { %996 = vmatmul.mubr.bf16.vlgmr.msra.gmra.mrb[8].mxu1 %v755_v31 }
 0x3b1   :  { %v839_v33 = vpop.f32.mrb[8].mxu1 }
 0x3b2   :  { %v840_v34 = vadd.f32 %v895_v32, %v839_v33  ;;  %v997_v35 = vpop.f32.mrb[9].mxu1 }
 0x3b3   :  { %v842_v36 = vpop.f32.mrb[10].mxu1 }
 0x3b4   :  { %845 = vst [vmem:[#allocation2] sm:$0xff] %v840_v34  ;;  %v998_v37 = vpop.f32.mrb[11].mxu1 }
 0x3b5   :  { %1081 = shalt.err (!%p1078_p4)
}
 0x3b6   :  { %s1082_s5 = scalar_lea.hbm %s1468_s6, 128 }
 0x3b7   :  { %p1083_p5 = scmp.ne.s32.totalorder %s1468_s6, %s1082_s5  ;;  %p1086_p6 = scmp.lt.u32.totalorder %s1082_s5, %s1468_s6 }
 0x3b9   :  { %p1088_p7 = pnand %p1086_p6, %p1083_p5 }
 0x3bb   :  { %1091 = shalt.err (!%p1088_p7)
}
 0x3bc   :  { %855 = dma.vmem_to_hbm [thread:$0]  %s853_s9, 128, %s1468_s6, [#allocation3]  }
 0x3bd   :  { %1092 = dma.done.wait [#allocation3], 128  }
 0x3be   :  { %1093 = vsyncadd [#allocation3], 4294967168 }
 0x3bf   :  { %859 = vsyncpa [#allocation3], 1 }

</bundles_post_ra>
